<compile_context>
chip_gen: v7x
topology: tpu7x:2x2x1
jax: 0.10.0
libtpu: 0.0.40
codegen_flags: <defaults>
</compile_context>

<pallas_src>
from functools import partial

import jax
import jax.numpy as jnp
from jax.experimental import pallas as pl
from jax.experimental.pallas import tpu as pltpu


def _round_up(x, m):
    return (x + m - 1) // m * m


def _pad2d(x, rows, cols):
    r, c = x.shape
    return jnp.pad(x, ((0, rows - r), (0, cols - c)))


# ---------------------------------------------------------------------------
# Tile selection / VMEM budgeting
# ---------------------------------------------------------------------------

def _pick_tk(Dp, cap):
    """Largest multiple of 128 that divides Dp (itself a multiple of 128), <= cap."""
    units = Dp // 128
    max_mult = max(1, min(units, cap // 128))
    for m in range(max_mult, 0, -1):
        if units % m == 0:
            return m * 128
    return 128


def _vmem_bytes(tm, tk, Ep, Dtp):
    """Rough VMEM footprint of the pipelined kernel (double-buffered blocks)."""
    bf16, f32 = 2, 4
    b = 0
    b += 2 * tm * tk * bf16          # image activations (double-buffered)
    b += 2 * tk * Ep * bf16          # image weight K-tile (double-buffered)
    b += 2 * 8 * Ep * f32            # image bias (sublane-padded)
    b += 2 * tm * Dtp * bf16         # pooled text (K-invariant, resident)
    b += 2 * Dtp * Ep * bf16         # text weight (resident)
    b += 2 * 8 * Ep * f32            # text bias
    b += 2 * 2 * tm * Ep * f32       # two f32 outputs, double-buffered
    b += tm * Ep * f32               # image f32 accumulator scratch
    b += tm * Ep * f32               # text f32 scratch
    return b


def _select_tiles(B, Dp, Ep, Dtp, vmem_cap=36 * 1024 * 1024):
    """Pick (tm, tk) maximizing weight-stream reuse while fitting VMEM on all gens."""
    tm = min(512, _round_up(B, 16))   # bf16 sublane packing needs multiples of 16
    tk_cap = 2048
    while True:
        tk = _pick_tk(Dp, tk_cap)
        budget = _vmem_bytes(tm, tk, Ep, Dtp)
        if budget <= vmem_cap or (tk <= 128 and tm <= 16):
            return tm, tk, budget
        if tk > 128:
            tk_cap = max(128, tk_cap // 2)
        else:
            tm = max(16, tm // 2)


# ---------------------------------------------------------------------------
# Kernel
# ---------------------------------------------------------------------------

def _clip_fused_kernel(xi_ref, wi_ref, bi_ref, xt_ref, wt_ref, bt_ref,
                       oi_ref, ot_ref, acc_ref, txt_ref):
    """Fused CLIP head.

    Image path: K-tiled matmul accumulated in an f32 VMEM scratch; at the last
    K step add bias and L2-normalize. Text path: its inputs are K-invariant and
    resident from k==0, so its (small) matmul runs under k==0 and overlaps the
    image weight DMA stream; only bias+normalize+store remain in the epilogue.
    """
    k = pl.program_id(1)

    @pl.when(k == 0)
    def _():
        acc_ref[...] = jnp.zeros_like(acc_ref)
        txt_ref[...] = jnp.dot(xt_ref[...], wt_ref[...],
                               preferred_element_type=jnp.float32)

    # bf16 operands on the MXU, f32 accumulation.
    acc_ref[...] += jnp.dot(xi_ref[...], wi_ref[...],
                            preferred_element_type=jnp.float32)

    @pl.when(k == pl.num_programs(1) - 1)
    def _():
        # ---- image epilogue: bias + row-wise L2 normalize (all f32) ----
        y = acc_ref[...] + bi_ref[...]
        sq = jnp.sum(y * y, axis=-1, keepdims=True)
        # clamp the *squared* sum at eps^2 -> identical to F.normalize's
        # max(||y||, 1e-12) denominator, including the zero-row case.
        inv = jax.lax.rsqrt(jnp.maximum(sq, 1e-24))
        oi_ref[...] = (y * inv).astype(oi_ref.dtype)

        # ---- text epilogue ----
        yt = txt_ref[...] + bt_ref[...]
        sqt = jnp.sum(yt * yt, axis=-1, keepdims=True)
        invt = jax.lax.rsqrt(jnp.maximum(sqt, 1e-24))
        ot_ref[...] = (yt * invt).astype(ot_ref.dtype)


# ---------------------------------------------------------------------------
# Wrapper (weights arrive pre-padded bf16; only activations cast/pad per call)
# ---------------------------------------------------------------------------

@partial(jax.jit, static_argnames=("out_dim",))
def clip_project_and_normalize(img_x, wi_p, bi_p, txt_x, wt_p, bt_p, *, out_dim):
    """Fused projection + L2-normalize for both modalities.

    img_x: [B, D]  f32 activations
    wi_p : [Dp, Ep] bf16 (pre-padded image weight), bi_p: [1, Ep] f32
    txt_x: [B, Dt] f32 pooled text activations
    wt_p : [Dtp, Ep] bf16 (pre-padded text weight), bt_p: [1, Ep] f32
    returns ([B, out_dim] f32, [B, out_dim] f32)
    """
    B, D = img_x.shape
    Dp, Ep = wi_p.shape
    Dtp = wt_p.shape[0]
    Dt = txt_x.shape[1]

    tm, tk, budget = _select_tiles(B, Dp, Ep, Dtp)
    M = _round_up(B, tm)

    # Per-call work: cast + pad activations only (zero padding is a no-op for
    # the matmul, bias add, and L2 norm).
    xi = _pad2d(img_x.astype(jnp.bfloat16), M, Dp)
    xt = _pad2d(txt_x.astype(jnp.bfloat16), M, Dtp)

    grid = (M // tm, Dp // tk)   # reduction (K) axis last; M//tm==1 typically
    vmem_limit = int(min(max(int(budget * 1.3), 8 << 20), 48 << 20))

    oi, ot = pl.pallas_call(
        _clip_fused_kernel,
        out_shape=(jax.ShapeDtypeStruct((M, Ep), jnp.float32),
                   jax.ShapeDtypeStruct((M, Ep), jnp.float32)),
        grid_spec=pltpu.PrefetchScalarGridSpec(
            num_scalar_prefetch=0,
            grid=grid,
            in_specs=[
                pl.BlockSpec((tm, tk), lambda i, k: (i, k)),    # image activations
                pl.BlockSpec((tk, Ep), lambda i, k: (k, 0)),    # image weight (K-tiled)
                pl.BlockSpec((1, Ep), lambda i, k: (0, 0)),     # image bias
                pl.BlockSpec((tm, Dtp), lambda i, k: (i, 0)),   # pooled text (K-invariant)
                pl.BlockSpec((Dtp, Ep), lambda i, k: (0, 0)),   # text weight
                pl.BlockSpec((1, Ep), lambda i, k: (0, 0)),     # text bias
            ],
            out_specs=[
                pl.BlockSpec((tm, Ep), lambda i, k: (i, 0)),    # image embeddings
                pl.BlockSpec((tm, Ep), lambda i, k: (i, 0)),    # text embeddings
            ],
            scratch_shapes=[
                pltpu.VMEM((tm, Ep), jnp.float32),   # image f32 accumulator
                pltpu.VMEM((tm, Ep), jnp.float32),   # text f32 projection
            ],
        ),
        compiler_params=pltpu.CompilerParams(
            # Row axis left "arbitrary": row-sharding a weight-bandwidth-bound
            # kernel across TensorCores would double the HBM weight stream.
            dimension_semantics=("arbitrary", "arbitrary"),
            vmem_limit_bytes=vmem_limit,
        ),
    )(xi, wi_p, bi_p, xt, wt_p, bt_p)

    return oi[:B, :out_dim], ot[:B, :out_dim]


class CLIPArchitecturePallas:
    """JAX/Pallas equivalent of torchmultimodal CLIPArchitecture."""

    def __init__(self, *, image_shape, vocab_size, seq_len, txt_embed_dim, proj_dim, key):
        C, H, W = image_shape
        k1, k2, k3, k4, k5 = jax.random.split(key, 5)
        img_in = C * H * W
        # Deterministic synthetic parameters (no checkpoint loading). f32
        # originals kept for the reference check below.
        self.w_img = jax.random.normal(k1, (img_in, proj_dim), jnp.float32) * (img_in ** -0.5)
        self.b_img = jax.random.normal(k2, (proj_dim,), jnp.float32) * 0.01
        self.tok_embed = jax.random.normal(k3, (vocab_size, txt_embed_dim), jnp.float32) * 0.02
        self.w_txt = jax.random.normal(k4, (txt_embed_dim, proj_dim), jnp.float32) * (txt_embed_dim ** -0.5)
        self.b_txt = jax.random.normal(k5, (proj_dim,), jnp.float32) * 0.01
        self.seq_len = seq_len
        self.proj_dim = proj_dim

        # ---- one-time weight preprocessing (hoisted out of the call path) ----
        Dp = _round_up(img_in, 128)
        Ep = _round_up(proj_dim, 128)
        Dtp = _round_up(txt_embed_dim, 128)
        self.wi_p = _pad2d(self.w_img.astype(jnp.bfloat16), Dp, Ep)
        self.bi_p = _pad2d(self.b_img.reshape(1, -1).astype(jnp.float32), 1, Ep)
        self.wt_p = _pad2d(self.w_txt.astype(jnp.bfloat16), Dtp, Ep)
        self.bt_p = _pad2d(self.b_txt.reshape(1, -1).astype(jnp.float32), 1, Ep)

    def __call__(self, image, text):
        B = image.shape[0]
        # vision glue: NCHW row-major flatten (same as torch.flatten).
        img_flat = image.reshape(B, -1).astype(jnp.float32)
        # text glue: embedding lookup + mean pool.
        # TODO(synk): for realistic seq lengths, move the gather + mean-pool into
        # the kernel via PrefetchScalarGridSpec row-gather; at S=8 it is noise.
        tok = jnp.take(self.tok_embed, text, axis=0)          # [B, S, txt_embed_dim]
        pooled = jnp.mean(tok, axis=1).astype(jnp.float32)    # [B, txt_embed_dim]

        img_emb, txt_emb = clip_project_and_normalize(
            img_flat, self.wi_p, self.bi_p, pooled, self.wt_p, self.bt_p,
            out_dim=self.proj_dim)
        return {"image": img_emb, "text": txt_emb}


def _ref_normalize(y):
    n = jnp.linalg.norm(y, axis=-1, keepdims=True)
    return y / jnp.maximum(n, 1e-12)


if __name__ == "__main__":
    key = jax.random.PRNGKey(0)
    k_img, k_txt, k_params = jax.random.split(key, 3)

    B, C, H, W = 2, 4, 16, 16
    S, VOCAB, TXT_D, PROJ = 8, 64, 32, 32

    image = jax.random.normal(k_img, (B, C, H, W), jnp.float32)
    text = jax.random.randint(k_txt, (B, S), 0, VOCAB, dtype=jnp.int32)

    model = CLIPArchitecturePallas(
        image_shape=(C, H, W),
        vocab_size=VOCAB,
        seq_len=S,
        txt_embed_dim=TXT_D,
        proj_dim=PROJ,
        key=k_params,
    )

    out = model(image, text)
    jax.block_until_ready(out)

    assert out["image"].shape == (B, PROJ)
    assert out["text"].shape == (B, PROJ)

    # sanity: embeddings are unit-norm rows (normalize runs in f32).
    img_norms = jnp.linalg.norm(out["image"], axis=-1)
    txt_norms = jnp.linalg.norm(out["text"], axis=-1)
    assert jnp.allclose(img_norms, 1.0, atol=1e-3), img_norms
    assert jnp.allclose(txt_norms, 1.0, atol=1e-3), txt_norms

    # reference check vs pure-JAX f32 math (loose tol: bf16 MXU operands).
    img_flat = image.reshape(B, -1).astype(jnp.float32)
    pooled = jnp.mean(jnp.take(model.tok_embed, text, axis=0), axis=1)
    ref_img = _ref_normalize(img_flat @ model.w_img + model.b_img)
    ref_txt = _ref_normalize(pooled @ model.w_txt + model.b_txt)
    assert jnp.allclose(out["image"], ref_img, atol=3e-2), jnp.max(jnp.abs(out["image"] - ref_img))
    assert jnp.allclose(out["text"], ref_txt, atol=3e-2), jnp.max(jnp.abs(out["text"] - ref_txt))

    print("KERNEL_OK")
</pallas_src>

<mosaic_0001>
module attributes {stable_mosaic.version = 11 : i64} {
  func.func @_clip_fused_kernel(%arg0: i32, %arg1: i32, %arg2: memref<16x1024xbf16, #tpu.memory_space<vmem>>, %arg3: memref<1024x128xbf16, #tpu.memory_space<vmem>>, %arg4: memref<1x128xf32, #tpu.memory_space<vmem>>, %arg5: memref<16x128xbf16, #tpu.memory_space<vmem>>, %arg6: memref<128x128xbf16, #tpu.memory_space<vmem>>, %arg7: memref<1x128xf32, #tpu.memory_space<vmem>>, %arg8: memref<16x128xf32, #tpu.memory_space<vmem>>, %arg9: memref<16x128xf32, #tpu.memory_space<vmem>>, %arg10: memref<16x128xf32, #tpu.memory_space<vmem>>, %arg11: memref<16x128xf32, #tpu.memory_space<vmem>>) attributes {dimension_semantics = [#tpu.dimension_semantics<arbitrary>, #tpu.dimension_semantics<arbitrary>], iteration_bounds = array<i64: 1, 1>, scalar_prefetch = 0 : i64, scratch_operands = 2 : i64, tpu.core_type = #tpu.core_type<tc>, window_params = [{transform_indices = @transform_0, window_bounds = array<i64: 16, 1024>}, {transform_indices = @transform_1, window_bounds = array<i64: 1024, 128>}, {pipeline_mode = #tpu.pipeline_mode<synchronous>, transform_indices = @transform_2, window_bounds = array<i64: 1, 128>}, {transform_indices = @transform_3, window_bounds = array<i64: 16, 128>}, {pipeline_mode = #tpu.pipeline_mode<synchronous>, transform_indices = @transform_4, window_bounds = array<i64: 128, 128>}, {pipeline_mode = #tpu.pipeline_mode<synchronous>, transform_indices = @transform_5, window_bounds = array<i64: 1, 128>}, {transform_indices = @transform_6, window_bounds = array<i64: 16, 128>}, {transform_indices = @transform_7, window_bounds = array<i64: 16, 128>}]} {
    %c0_i32 = arith.constant 0 : i32
    %0 = arith.cmpi eq, %arg1, %c0_i32 : i32
    %1 = arith.extui %0 : i1 to i32
    %c0_i32_0 = arith.constant 0 : i32
    %2 = arith.cmpi ne, %1, %c0_i32_0 : i32
    scf.if %2 {
      %cst_10 = arith.constant 0.000000e+00 : f32
      %12 = vector.broadcast %cst_10 : f32 to vector<16x128xf32>
      %c0_11 = arith.constant 0 : index
      %c0_12 = arith.constant 0 : index
      %13 = vector.load %arg10[%c0_11, %c0_12] : memref<16x128xf32, #tpu.memory_space<vmem>>, vector<16x128xf32>
      tpu.vector_store %arg10[%c0_11, %c0_12], %12 {strides = array<i32>} : memref<16x128xf32, #tpu.memory_space<vmem>>, vector<16x128xf32>,
      %c0_13 = arith.constant 0 : index
      %c0_14 = arith.constant 0 : index
      %14 = vector.load %arg5[%c0_13, %c0_14] : memref<16x128xbf16, #tpu.memory_space<vmem>>, vector<16x128xbf16>
      %c0_15 = arith.constant 0 : index
      %c0_16 = arith.constant 0 : index
      %15 = vector.load %arg6[%c0_15, %c0_16] : memref<128x128xbf16, #tpu.memory_space<vmem>>, vector<128x128xbf16>
      %cst_17 = arith.constant dense<0.000000e+00> : vector<16x128xf32>
      %16 = tpu.matmul %14, %15, %cst_17 {dimension_numbers = #tpu.dot_dimension_numbers<[1], [0], [0], [1], [0, 0, 1, 1], [], []>} : vector<16x128xbf16>, vector<128x128xbf16>, vector<16x128xf32> -> vector<16x128xf32>
      %c0_18 = arith.constant 0 : index
      %c0_19 = arith.constant 0 : index
      %17 = vector.load %arg11[%c0_18, %c0_19] : memref<16x128xf32, #tpu.memory_space<vmem>>, vector<16x128xf32>
      tpu.vector_store %arg11[%c0_18, %c0_19], %16 {strides = array<i32>} : memref<16x128xf32, #tpu.memory_space<vmem>>, vector<16x128xf32>,
    } else {
    }
    %c0 = arith.constant 0 : index
    %c0_1 = arith.constant 0 : index
    %3 = vector.load %arg10[%c0, %c0_1] : memref<16x128xf32, #tpu.memory_space<vmem>>, vector<16x128xf32>
    %c0_2 = arith.constant 0 : index
    %c0_3 = arith.constant 0 : index
    %4 = vector.load %arg2[%c0_2, %c0_3] : memref<16x1024xbf16, #tpu.memory_space<vmem>>, vector<16x1024xbf16>
    %c0_4 = arith.constant 0 : index
    %c0_5 = arith.constant 0 : index
    %5 = vector.load %arg3[%c0_4, %c0_5] : memref<1024x128xbf16, #tpu.memory_space<vmem>>, vector<1024x128xbf16>
    %cst = arith.constant dense<0.000000e+00> : vector<16x128xf32>
    %6 = tpu.matmul %4, %5, %cst {dimension_numbers = #tpu.dot_dimension_numbers<[1], [0], [0], [1], [0, 0, 1, 1], [], []>} : vector<16x1024xbf16>, vector<1024x128xbf16>, vector<16x128xf32> -> vector<16x128xf32>
    %7 = arith.addf %3, %6 : vector<16x128xf32>
    %c0_6 = arith.constant 0 : index
    %c0_7 = arith.constant 0 : index
    %8 = vector.load %arg10[%c0_6, %c0_7] : memref<16x128xf32, #tpu.memory_space<vmem>>, vector<16x128xf32>
    tpu.vector_store %arg10[%c0_6, %c0_7], %7 {strides = array<i32>} : memref<16x128xf32, #tpu.memory_space<vmem>>, vector<16x128xf32>,
    %c0_i32_8 = arith.constant 0 : i32
    %9 = arith.cmpi eq, %arg1, %c0_i32_8 : i32
    %10 = arith.extui %9 : i1 to i32
    %c0_i32_9 = arith.constant 0 : i32
    %11 = arith.cmpi ne, %10, %c0_i32_9 : i32
    scf.if %11 {
      %c0_10 = arith.constant 0 : index
      %c0_11 = arith.constant 0 : index
      %12 = vector.load %arg10[%c0_10, %c0_11] : memref<16x128xf32, #tpu.memory_space<vmem>>, vector<16x128xf32>
      %c0_12 = arith.constant 0 : index
      %c0_13 = arith.constant 0 : index
      %13 = vector.load %arg4[%c0_12, %c0_13] : memref<1x128xf32, #tpu.memory_space<vmem>>, vector<1x128xf32>
      %14 = vector.broadcast %13 : vector<1x128xf32> to vector<16x128xf32>
      %15 = arith.addf %12, %14 : vector<16x128xf32>
      %16 = arith.mulf %15, %15 : vector<16x128xf32>
      %cst_14 = arith.constant dense<0.000000e+00> : vector<16xf32>
      %17 = vector.multi_reduction <add>, %16, %cst_14 [1] : vector<16x128xf32> to vector<16xf32>
      %18 = vector.shape_cast %17 : vector<16xf32> to vector<16x1xf32>
      %cst_15 = arith.constant 1.000000e-24 : f32
      %19 = vector.broadcast %cst_15 : f32 to vector<16x1xf32>
      %20 = arith.maximumf %18, %19 : vector<16x1xf32>
      %21 = math.rsqrt %20 : vector<16x1xf32>
      %22 = vector.broadcast %21 : vector<16x1xf32> to vector<16x128xf32>
      %23 = arith.mulf %15, %22 : vector<16x128xf32>
      %c0_16 = arith.constant 0 : index
      %c0_17 = arith.constant 0 : index
      %24 = vector.load %arg8[%c0_16, %c0_17] : memref<16x128xf32, #tpu.memory_space<vmem>>, vector<16x128xf32>
      tpu.vector_store %arg8[%c0_16, %c0_17], %23 {strides = array<i32>} : memref<16x128xf32, #tpu.memory_space<vmem>>, vector<16x128xf32>,
      %c0_18 = arith.constant 0 : index
      %c0_19 = arith.constant 0 : index
      %25 = vector.load %arg11[%c0_18, %c0_19] : memref<16x128xf32, #tpu.memory_space<vmem>>, vector<16x128xf32>
      %c0_20 = arith.constant 0 : index
      %c0_21 = arith.constant 0 : index
      %26 = vector.load %arg7[%c0_20, %c0_21] : memref<1x128xf32, #tpu.memory_space<vmem>>, vector<1x128xf32>
      %27 = vector.broadcast %26 : vector<1x128xf32> to vector<16x128xf32>
      %28 = arith.addf %25, %27 : vector<16x128xf32>
      %29 = arith.mulf %28, %28 : vector<16x128xf32>
      %cst_22 = arith.constant dense<0.000000e+00> : vector<16xf32>
      %30 = vector.multi_reduction <add>, %29, %cst_22 [1] : vector<16x128xf32> to vector<16xf32>
      %31 = vector.shape_cast %30 : vector<16xf32> to vector<16x1xf32>
      %cst_23 = arith.constant 1.000000e-24 : f32
      %32 = vector.broadcast %cst_23 : f32 to vector<16x1xf32>
      %33 = arith.maximumf %31, %32 : vector<16x1xf32>
      %34 = math.rsqrt %33 : vector<16x1xf32>
      %35 = vector.broadcast %34 : vector<16x1xf32> to vector<16x128xf32>
      %36 = arith.mulf %28, %35 : vector<16x128xf32>
      %c0_24 = arith.constant 0 : index
      %c0_25 = arith.constant 0 : index
      %37 = vector.load %arg9[%c0_24, %c0_25] : memref<16x128xf32, #tpu.memory_space<vmem>>, vector<16x128xf32>
      tpu.vector_store %arg9[%c0_24, %c0_25], %36 {strides = array<i32>} : memref<16x128xf32, #tpu.memory_space<vmem>>, vector<16x128xf32>,
    } else {
    }
    return
  }
  func.func @transform_0(%arg0: i32, %arg1: i32) -> (i32, i32) {
    %c0_i32 = arith.constant 0 : i32
    return %arg0, %arg1 : i32, i32
  }
  func.func @transform_1(%arg0: i32, %arg1: i32) -> (i32, i32) {
    %c0_i32 = arith.constant 0 : i32
    %c0_i32_0 = arith.constant 0 : i32
    return %arg1, %c0_i32 : i32, i32
  }
  func.func @transform_2(%arg0: i32, %arg1: i32) -> (i32, i32) {
    %c0_i32 = arith.constant 0 : i32
    %c0_i32_0 = arith.constant 0 : i32
    %c0_i32_1 = arith.constant 0 : i32
    return %c0_i32, %c0_i32_0 : i32, i32
  }
  func.func @transform_3(%arg0: i32, %arg1: i32) -> (i32, i32) {
    %c0_i32 = arith.constant 0 : i32
    %c0_i32_0 = arith.constant 0 : i32
    return %arg0, %c0_i32 : i32, i32
  }
  func.func @transform_4(%arg0: i32, %arg1: i32) -> (i32, i32) {
    %c0_i32 = arith.constant 0 : i32
    %c0_i32_0 = arith.constant 0 : i32
    %c0_i32_1 = arith.constant 0 : i32
    return %c0_i32, %c0_i32_0 : i32, i32
  }
  func.func @transform_5(%arg0: i32, %arg1: i32) -> (i32, i32) {
    %c0_i32 = arith.constant 0 : i32
    %c0_i32_0 = arith.constant 0 : i32
    %c0_i32_1 = arith.constant 0 : i32
    return %c0_i32, %c0_i32_0 : i32, i32
  }
  func.func @transform_6(%arg0: i32, %arg1: i32) -> (i32, i32) {
    %c0_i32 = arith.constant 0 : i32
    %c0_i32_0 = arith.constant 0 : i32
    return %arg0, %c0_i32 : i32, i32
  }
  func.func @transform_7(%arg0: i32, %arg1: i32) -> (i32, i32) {
    %c0_i32 = arith.constant 0 : i32
    %c0_i32_0 = arith.constant 0 : i32
    return %arg0, %c0_i32 : i32, i32
  }
}

</mosaic_0001>

<bundles_post_ra>
// kernel: clip_project_and_normalize.1
= control target key start
LH: loop header
LB: loop body
LE: loop exit
PB: predicated region body
PF: predicated region fallthrough
CT: control target
= control target key end

     0   :  { %13 = vsyncpa [#allocation5], 0  ;;  %s1263_s24 = smov [#allocation4]   ;;  %s1389_s0 = inlined_call_operand.vmem [shape: bf16[16,1024], index: 0, kind: input, shape index: {}]   ;;  %s1390_s1 = inlined_call_operand.hbm [shape: bf16[1024,128], index: 1, kind: input, shape index: {}]   ;;  %s1391_s2 = inlined_call_operand.vmem [shape: f32[1,128], index: 2, kind: input, shape index: {}]   ;;  %s1392_s3 = inlined_call_operand.vmem [shape: bf16[16,128], index: 3, kind: input, shape index: {}]   ;;  %s1393_s4 = inlined_call_operand.vmem [shape: bf16[128,128], index: 4, kind: input, shape index: {}]   ;;  %s1394_s5 = inlined_call_operand.vmem [shape: f32[1,128], index: 5, kind: input, shape index: {}]   ;;  %s1395_s6 = inlined_call_operand.vmem [shape: f32[16,128], index: 6, kind: output, shape index: {0}]   ;;  %s1396_s7 = inlined_call_operand.vmem [shape: f32[16,128], index: 7, kind: output, shape index: {1}]  }
   0x1   :  { %s21_s25 = sshll.u32 %s1263_s24, 4  ;;  %s1239_s28 = scalar_lea.hbm %s1390_s1, 8192  ;;  %s22_s25 = int_to_ptr.vmem [resolvable:$true] %s21_s25 }
   0x2   :  { %p1240_p0 = scmp.ne.s32.totalorder %s1390_s1, %s1239_s28  ;;  %p1243_p1 = scmp.lt.u32.totalorder %s1239_s28, %s1390_s1 }
   0x4   :  { %p1245_p2 = pnand %p1243_p1, %p1240_p0 }
   0x6   :  { %1248 = shalt.err (!%p1245_p2)
}
   0x7   :  { %s1249_s10 = scalar_lea.vmem %s22_s25, 8192  ;;  %p1254_p4 = scmp.lt.s32.totalorder %s22_s25, %s22_s25 }
   0x8   :  { %p1250_p3 = scmp.ne.s32.totalorder %s22_s25, %s1249_s10  ;;  %p1255_p5 = scmp.lt.s32.totalorder %s1249_s10, %s1249_s10 }
   0xa   :  { %p1256_p6 = por %p1255_p5, %p1254_p4 }
   0xc   :  { %p1257_p7 = pnand %p1256_p6, %p1250_p3 }
   0xe   :  { %1260 = shalt.err (!%p1257_p7)
}
   0xf   :  { %s1264_s11 = smov 64   ;;  %s1265_s12 = smov 4  }
  0x10   :  { %27 = dma.hbm_to_vmem [thread:$0]  %s1390_s1, 8192, %s22_s25, [#allocation5], %s1264_s11, %s1264_s11, %s1265_s12  }
  0x11   :  { %1261 = dma.done.wait [#allocation5], 8192  }
  0x12   :  { %1262 = vsyncadd [#allocation5], 4294959104  ;;  %v1266_v0 = vmov 0.0   ;;  %vm1267_vm0 = vmmov 0   ;;  %v1158_v1 = vld [vmem:[%s1393_s4] sm:$0xff]   ;;  %v1161_v4 = vld [vmem:[%s1393_s4 + $0x8] sm:$0xff]  }
  0x13   :  { %1133 = vmatprep.subr.bf16.mxu0 %v1266_v0  ;;  %1149 = vmatprep.mubr.msk.bf16.mxu0 %vm1267_vm0, %v1266_v0  ;;  %v1159_v2 = vld [vmem:[#allocation4 + $0x40] sm:$0xff]   ;;  %v1162_v5 = vld [vmem:[#allocation4 + $0x48] sm:$0xff]   ;;  %v1164_v7 = vld [vmem:[%s1393_s4 + $0x10] sm:$0xff]  }
  0x14   :  { %1134 = vmatpush3.bf16.msra.mxu0 %v1158_v1  ;;  %v1160_v3 = vld [vmem:[#allocation4] sm:$0xff]   ;;  %1045 = vmatprep.subr.bf16.mxu1 %v1159_v2  ;;  %v1163_v6 = vld [vmem:[#allocation4 + $0x8] sm:$0xff]   ;;  %v1165_v8 = vld [vmem:[#allocation4 + $0x50] sm:$0xff]  }
  0x15   :  { %1135 = vmatprep.subr.bf16.mxu0 %v1266_v0  ;;  %1046 = vmatpush3.bf16.msra.mxu1 %v1160_v3  ;;  %v1166_v9 = vld [vmem:[#allocation4 + $0x10] sm:$0xff]   ;;  %v1167_v10 = vld [vmem:[%s1393_s4 + $0x18] sm:$0xff]   ;;  %v1171_v13 = vld [vmem:[#allocation4 + $0x60] sm:$0xff]  }
  0x16   :  { %1047 = vmatprep.subr.bf16.mxu1 %v1162_v5  ;;  %v1168_v11 = vld [vmem:[#allocation4 + $0x58] sm:$0xff]   ;;  %v1170_v14 = vld [vmem:[%s1393_s4 + $0x20] sm:$0xff]   ;;  %v1174_v16 = vld [vmem:[#allocation4 + $0x68] sm:$0xff]  }
  0x17   :  { %v1169_v12 = vld [vmem:[#allocation4 + $0x18] sm:$0xff]   ;;  %v1172_v15 = vld [vmem:[#allocation4 + $0x20] sm:$0xff]   ;;  %v1173_v17 = vld [vmem:[%s1393_s4 + $0x28] sm:$0xff]  }
  0x18   :  { %1136 = vmatpush3.bf16.msra.mxu0 %v1161_v4  ;;  %v1175_v18 = vld [vmem:[#allocation4 + $0x28] sm:$0xff]   ;;  %v1177_v19 = vld [vmem:[#allocation4 + $0x70] sm:$0xff]   ;;  %v1179_v22 = vld [vmem:[%s1393_s4 + $0x38] sm:$0xff]  }
  0x19   :  { %1137 = vmatprep.subr.bf16.mxu0 %v1266_v0  ;;  %1048 = vmatpush3.bf16.msra.mxu1 %v1163_v6  ;;  %v1176_v20 = vld [vmem:[%s1393_s4 + $0x30] sm:$0xff]   ;;  %v1180_v23 = vld [vmem:[#allocation4 + $0x78] sm:$0xff]   ;;  %v1183_v25 = vld [vmem:[#allocation4 + $0xc0] sm:$0xff]  }
  0x1a   :  { %1049 = vmatprep.subr.bf16.mxu1 %v1165_v8  ;;  %v1178_v21 = vld [vmem:[#allocation4 + $0x30] sm:$0xff]   ;;  %v1181_v24 = vld [vmem:[#allocation4 + $0x38] sm:$0xff]   ;;  %v1182_v26 = vld [vmem:[%s1392_s3] sm:$0xff]  }
  0x1b   :  { %v163_v27 = vld [vmem:[%s1389_s0] sm:$0xff]  ;;  %v1187_v34 = vld [vmem:[#allocation4 + $0xc8] sm:$0xff]   ;;  %v1191_v38 = vld [vmem:[#allocation4 + $0xd0] sm:$0xff]  }
  0x1c   :  { %1138 = vmatpush3.bf16.msra.mxu0 %v1164_v7  ;;  %v167_v28 = vld [vmem:[%s1389_s0 + $0x20] sm:$0xff]  ;;  %v1188_v35 = vld [vmem:[#allocation4 + $0x88] sm:$0xff]   ;;  %v1192_v39 = vld [vmem:[#allocation4 + $0x90] sm:$0xff]  }
  0x1d   :  { %1139 = vmatprep.subr.bf16.mxu0 %v1266_v0  ;;  %1050 = vmatpush3.bf16.msra.mxu1 %v1166_v9  ;;  %v1184_v29 = vld [vmem:[#allocation4 + $0x80] sm:$0xff]   ;;  %v963_v30 = vcombine.high %v163_v27, %v167_v28  ;;  %v962_v33 = vcombine.low %v163_v27, %v167_v28  ;;  %v1189_v36 = vld [vmem:[#allocation4 + $0x148] sm:$0xff]   ;;  %v1193_v40 = vld [vmem:[#allocation4 + $0x150] sm:$0xff]  }
  0x1e   :  { %1051 = vmatprep.subr.bf16.mxu1 %v1168_v11  ;;  %v1185_v31 = vld [vmem:[#allocation4 + $0x140] sm:$0xff]   ;;  %v1190_v37 = vld [vmem:[#allocation4 + $0x108] sm:$0xff]   ;;  %v1194_v41 = vld [vmem:[#allocation4 + $0x110] sm:$0xff]  }
  0x1f   :  { %755 = vmatprep.mubr.bf16.mxu1 %v963_v30  ;;  %v1186_v32 = vld [vmem:[#allocation4 + $0x100] sm:$0xff]   ;;  %v1195_v42 = vld [vmem:[#allocation4 + $0xd8] sm:$0xff]   ;;  %v1203_v50 = vld [vmem:[#allocation4 + $0xe8] sm:$0xff]  }
  0x20   :  { %1140 = vmatpush3.bf16.msra.mxu0 %v1167_v10  ;;  %v1196_v43 = vld [vmem:[#allocation4 + $0x98] sm:$0xff]   ;;  %v1199_v46 = vld [vmem:[#allocation4 + $0xe0] sm:$0xff]   ;;  %v1204_v51 = vld [vmem:[#allocation4 + $0xa8] sm:$0xff]  }
  0x21   :  { %1141 = vmatprep.subr.bf16.mxu0 %v1266_v0  ;;  %1052 = vmatpush3.bf16.msra.mxu1 %v1169_v12  ;;  %v1197_v44 = vld [vmem:[#allocation4 + $0x158] sm:$0xff]   ;;  %v1200_v47 = vld [vmem:[#allocation4 + $0xa0] sm:$0xff]   ;;  %v1205_v52 = vld [vmem:[#allocation4 + $0x168] sm:$0xff]  }
  0x22   :  { %1053 = vmatprep.subr.bf16.mxu1 %v1171_v13  ;;  %v1198_v45 = vld [vmem:[#allocation4 + $0x118] sm:$0xff]   ;;  %v1201_v48 = vld [vmem:[#allocation4 + $0x160] sm:$0xff]   ;;  %v1206_v53 = vld [vmem:[#allocation4 + $0x128] sm:$0xff]  }
  0x23   :  { %v1202_v49 = vld [vmem:[#allocation4 + $0x120] sm:$0xff]   ;;  %v1207_v54 = vld [vmem:[#allocation4 + $0xf0] sm:$0xff]   ;;  %v1211_v58 = vld [vmem:[#allocation4 + $0xf8] sm:$0xff]  }
  0x24   :  { %1142 = vmatpush3.bf16.msra.mxu0 %v1170_v14  ;;  %v1208_v55 = vld [vmem:[#allocation4 + $0xb0] sm:$0xff]   ;;  %v1213_v59 = vld [vmem:[#allocation4 + $0x178] sm:$0xff]   ;;  %v164_v60 = vld [vmem:[%s1389_s0 + $0x8] sm:$0xff] }
  0x25   :  { %1143 = vmatprep.subr.bf16.mxu0 %v1266_v0  ;;  %1054 = vmatpush3.bf16.msra.mxu1 %v1172_v15  ;;  %v1209_v56 = vld [vmem:[#allocation4 + $0x170] sm:$0xff]   ;;  %v168_v61 = vld [vmem:[%s1389_s0 + $0x28] sm:$0xff]  ;;  %v1212_v62 = vld [vmem:[#allocation4 + $0xb8] sm:$0xff]  }
  0x26   :  { %1055 = vmatprep.subr.bf16.mxu1 %v1174_v16  ;;  %v1210_v57 = vld [vmem:[#allocation4 + $0x130] sm:$0xff]   ;;  %v965_v63 = vcombine.high %v164_v60, %v168_v61  ;;  %v1214_v3 = vld [vmem:[#allocation4 + $0x138] sm:$0xff]   ;;  %v964_v5 = vcombine.low %v164_v60, %v168_v61  ;;  %v1216_v6 = vld [vmem:[#allocation4 + $0x180] sm:$0xff]  }
  0x27   :  { %v165_v1 = vld [vmem:[%s1389_s0 + $0x10] sm:$0xff]  ;;  %v1217_v8 = vld [vmem:[#allocation4 + $0x1c8] sm:$0xff]   ;;  %v1221_v12 = vld [vmem:[#allocation4 + $0x1d8] sm:$0xff]  }
  0x28   :  { %1144 = vmatpush3.bf16.msra.mxu0 %v1173_v17  ;;  %v169_v2 = vld [vmem:[%s1389_s0 + $0x30] sm:$0xff]  ;;  %v1218_v9 = vld [vmem:[#allocation4 + $0x188] sm:$0xff]   ;;  %v1222_v13 = vld [vmem:[#allocation4 + $0x198] sm:$0xff]  }
  0x29   :  { %1145 = vmatprep.subr.bf16.mxu0 %v1266_v0  ;;  %1056 = vmatpush3.bf16.msra.mxu1 %v1175_v18  ;;  %v967_v4 = vcombine.high %v165_v1, %v169_v2  ;;  %v966_v7 = vcombine.low %v165_v1, %v169_v2  ;;  %v1219_v10 = vld [vmem:[#allocation4 + $0x1d0] sm:$0xff]   ;;  %v1223_v14 = vld [vmem:[#allocation4 + $0x1e0] sm:$0xff]   ;;  %v166_v15 = vld [vmem:[%s1389_s0 + $0x18] sm:$0xff] }
  0x2a   :  { %1057 = vmatprep.subr.bf16.mxu1 %v1177_v19  ;;  %v1220_v11 = vld [vmem:[#allocation4 + $0x190] sm:$0xff]   ;;  %v170_v16 = vld [vmem:[%s1389_s0 + $0x38] sm:$0xff]  ;;  %v1224_v18 = vld [vmem:[#allocation4 + $0x1a0] sm:$0xff]  }
  0x2b   :  { %v969_v17 = vcombine.high %v166_v15, %v170_v16  ;;  %v1225_v19 = vld [vmem:[#allocation4 + $0x1e8] sm:$0xff]  }
  0x2c   :  { %1146 = vmatpush3.bf16.msra.mxu0 %v1176_v20  ;;  %v1226_v20 = vld [vmem:[#allocation4 + $0x1a8] sm:$0xff]  }
  0x2d   :  { %1147 = vmatprep.subr.bf16.mxu0 %v1266_v0  ;;  %1058 = vmatpush3.bf16.msra.mxu1 %v1178_v21  ;;  %v1215_v0 = vld [vmem:[#allocation4 + $0x1c0] sm:$0xff]   ;;  %v1227_v21 = vld [vmem:[#allocation4 + $0x1f0] sm:$0xff]  }
  0x2e   :  { %1059 = vmatprep.subr.bf16.mxu1 %v1180_v23  ;;  %v1229_v23 = vld [vmem:[#allocation4 + $0x1f8] sm:$0xff]  }
  0x30   :  { %1148 = vmatpush3.bf16.msra.mxu0 %v1179_v22  ;;  %v1228_v22 = vld [vmem:[#allocation4 + $0x1b0] sm:$0xff]  }
  0x31   :  { %1067 = vmatprep.subr.bf16.mxu0 %v1183_v25  ;;  %1060 = vmatpush3.bf16.msra.mxu1 %v1181_v24  ;;  %v1230_v24 = vld [vmem:[#allocation4 + $0x1b8] sm:$0xff]   ;;  %v968_v25 = vcombine.low %v166_v15, %v170_v16 }
  0x32   :  { %1089 = vmatprep.subr.bf16.mxu1 %v1185_v31 }
  0x33   :  { %1150 = vmatmul.mubr.bf16.vlgmr.msra.gmra.mrb[0].mxu0 %v1182_v26  ;;  %v1035_v26 = vld [vmem:[%s1394_s5] ss:$0 sm:$0xff] }
  0x34   :  { %1068 = vmatpush3.bf16.msra.mxu0 %v1184_v29  ;;  %756 = vmatmul.mubr.bf16.vlgmr.msra.gmra.mrb[0].mxu1 %v962_v33 }
  0x35   :  { %1069 = vmatprep.subr.bf16.mxu0 %v1187_v34  ;;  %1090 = vmatpush3.bf16.msra.mxu1 %v1186_v32 }
  0x36   :  { %1091 = vmatprep.subr.bf16.mxu1 %v1189_v36  ;;  %796 = vmatprep.mubr.bf16.mxu0 %v965_v63 }
  0x37   :  { %837 = vmatprep.mubr.bf16.mxu1 %v967_v4 }
  0x38   :  { %1070 = vmatpush3.bf16.msra.mxu0 %v1188_v35 }
  0x39   :  { %1071 = vmatprep.subr.bf16.mxu0 %v1191_v38  ;;  %1092 = vmatpush3.bf16.msra.mxu1 %v1190_v37 }
  0x3a   :  { %1093 = vmatprep.subr.bf16.mxu1 %v1193_v40 }
  0x3c   :  { %1072 = vmatpush3.bf16.msra.mxu0 %v1192_v39 }
  0x3d   :  { %1073 = vmatprep.subr.bf16.mxu0 %v1195_v42  ;;  %1094 = vmatpush3.bf16.msra.mxu1 %v1194_v41 }
  0x3e   :  { %1095 = vmatprep.subr.bf16.mxu1 %v1197_v44 }
  0x40   :  { %1074 = vmatpush3.bf16.msra.mxu0 %v1196_v43 }
  0x41   :  { %1075 = vmatprep.subr.bf16.mxu0 %v1199_v46  ;;  %1096 = vmatpush3.bf16.msra.mxu1 %v1198_v45 }
  0x42   :  { %1097 = vmatprep.subr.bf16.mxu1 %v1201_v48 }
  0x44   :  { %1076 = vmatpush3.bf16.msra.mxu0 %v1200_v47 }
  0x45   :  { %1077 = vmatprep.subr.bf16.mxu0 %v1203_v50  ;;  %1098 = vmatpush3.bf16.msra.mxu1 %v1202_v49 }
  0x46   :  { %1099 = vmatprep.subr.bf16.mxu1 %v1205_v52 }
  0x48   :  { %1078 = vmatpush3.bf16.msra.mxu0 %v1204_v51 }
  0x49   :  { %1079 = vmatprep.subr.bf16.mxu0 %v1207_v54  ;;  %1100 = vmatpush3.bf16.msra.mxu1 %v1206_v53 }
  0x4a   :  { %1101 = vmatprep.subr.bf16.mxu1 %v1209_v56 }
  0x4c   :  { %1080 = vmatpush3.bf16.msra.mxu0 %v1208_v55 }
  0x4d   :  { %1081 = vmatprep.subr.bf16.mxu0 %v1211_v58  ;;  %1102 = vmatpush3.bf16.msra.mxu1 %v1210_v57 }
  0x4e   :  { %1103 = vmatprep.subr.bf16.mxu1 %v1213_v59 }
  0x50   :  { %1082 = vmatpush3.bf16.msra.mxu0 %v1212_v62  ;;  %v1034_v62 = vld [vmem:[%s1391_s2] ss:$0 sm:$0xff] }
  0x51   :  { %1111 = vmatprep.subr.bf16.mxu0 %v1215_v0  ;;  %1104 = vmatpush3.bf16.msra.mxu1 %v1214_v3 }
  0x53   :  { %797 = vmatmul.mubr.bf16.vlgmr.msra.gmra.mrb[4].mxu0 %v964_v5 }
  0x54   :  { %1112 = vmatpush3.bf16.msra.mxu0 %v1216_v6  ;;  %838 = vmatmul.mubr.bf16.vlgmr.msra.gmra.mrb[4].mxu1 %v966_v7 }
  0x55   :  { %1113 = vmatprep.subr.bf16.mxu0 %v1217_v8  ;;  %878 = vmatprep.mubr.bf16.mxu0 %v969_v17 }
  0x58   :  { %1114 = vmatpush3.bf16.msra.mxu0 %v1218_v9 }
  0x59   :  { %1115 = vmatprep.subr.bf16.mxu0 %v1219_v10 }
  0x5c   :  { %1116 = vmatpush3.bf16.msra.mxu0 %v1220_v11 }
  0x5d   :  { %1117 = vmatprep.subr.bf16.mxu0 %v1221_v12 }
  0x60   :  { %1118 = vmatpush3.bf16.msra.mxu0 %v1222_v13 }
  0x61   :  { %1119 = vmatprep.subr.bf16.mxu0 %v1223_v14 }
  0x64   :  { %1120 = vmatpush3.bf16.msra.mxu0 %v1224_v18 }
  0x65   :  { %1121 = vmatprep.subr.bf16.mxu0 %v1225_v19 }
  0x68   :  { %1122 = vmatpush3.bf16.msra.mxu0 %v1226_v20 }
  0x69   :  { %1123 = vmatprep.subr.bf16.mxu0 %v1227_v21 }
  0x6c   :  { %1124 = vmatpush3.bf16.msra.mxu0 %v1228_v22 }
  0x6d   :  { %1125 = vmatprep.subr.bf16.mxu0 %v1229_v23 }
  0x70   :  { %1126 = vmatpush3.bf16.msra.mxu0 %v1230_v24 }
  0x73   :  { %879 = vmatmul.mubr.bf16.vlgmr.msra.gmra.mrb[8].mxu0 %v968_v25 }
 0x106   :  { %v152_v27 = vpop.f32.mrb[0].mxu0 }
 0x107   :  { %v928_v28 = vadd.f32 %v1035_v26, %v152_v27  ;;  %v1151_v29 = vpop.f32.mrb[1].mxu0  ;;  %v1061_v31 = vpop.f32.mrb[0].mxu1 }
 0x108   :  { %v155_v30 = vpop.f32.mrb[2].mxu0  ;;  %v1062_v35 = vpop.f32.mrb[1].mxu1 }
 0x109   :  { %v929_v32 = vadd.f32 %v1035_v26, %v155_v30  ;;  %v1152_v33 = vpop.f32.mrb[3].mxu0  ;;  %v930_v34 = vmul.f32 %v928_v28, %v928_v28  ;;  %v1063_v36 = vadd.f32 %v1062_v35, %v1061_v31  ;;  %v1064_v37 = vpop.f32.mrb[2].mxu1 }
 0x10a   :  { %v1065_v38 = vpop.f32.mrb[3].mxu1 }
 0x10b   :  { %932 = vadd.xlane.f32.xlu1 %v930_v34  ;;  %v1066_v39 = vadd.f32 %v1065_v38, %v1064_v37  ;;  %v931_v40 = vmul.f32 %v929_v32, %v929_v32 }
 0x10f   :  { %934 = vadd.xlane.f32.xlu1 %v931_v40 }
 0x126   :  { %v1083_v41 = vpop.f32.mrb[4].mxu0 }
 0x127   :  { %v1084_v42 = vpop.f32.mrb[5].mxu0  ;;  %v1105_v45 = vpop.f32.mrb[4].mxu1 }
 0x128   :  { %v1085_v43 = vadd.f32 %v1084_v42, %v1083_v41  ;;  %v1086_v44 = vpop.f32.mrb[6].mxu0  ;;  %v1106_v47 = vpop.f32.mrb[5].mxu1 }
 0x129   :  { %v1087_v46 = vpop.f32.mrb[7].mxu0  ;;  %v1107_v50 = vadd.f32 %v1106_v47, %v1105_v45  ;;  %v1108_v51 = vpop.f32.mrb[6].mxu1 }
 0x12a   :  { %v799_v48 = vadd.f32 %v1085_v43, %v1063_v36  ;;  %v1088_v49 = vadd.f32 %v1087_v46, %v1086_v44  ;;  %v1109_v52 = vpop.f32.mrb[7].mxu1 }
 0x12b   :  { %v1110_v55 = vadd.f32 %v1109_v52, %v1108_v51 }
 0x12c   :  { %v802_v53 = vadd.f32 %v1088_v49, %v1066_v39  ;;  %v840_v54 = vadd.f32 %v1107_v50, %v799_v48 }
 0x12e   :  { %v843_v56 = vadd.f32 %v1110_v55, %v802_v53 }
 0x146   :  { %v1127_v57 = vpop.f32.mrb[8].mxu0 }
 0x147   :  { %v1128_v58 = vpop.f32.mrb[9].mxu0 }
 0x148   :  { %v1129_v59 = vadd.f32 %v1128_v58, %v1127_v57  ;;  %v1130_v60 = vpop.f32.mrb[10].mxu0 }
 0x149   :  { %v1131_v61 = vpop.f32.mrb[11].mxu0 }
 0x14a   :  { %v881_v63 = vadd.f32 %v1129_v59, %v840_v54  ;;  %v1132_v0 = vadd.f32 %v1131_v61, %v1130_v60 }
 0x14c   :  { %v884_v1 = vadd.f32 %v1132_v0, %v843_v56  ;;  %v903_v2 = vadd.f32 %v1034_v62, %v881_v63 }
 0x14e   :  { %v905_v3 = vmul.f32 %v903_v2, %v903_v2  ;;  %v904_v4 = vadd.f32 %v1034_v62, %v884_v1 }
 0x150   :  { %907 = vadd.xlane.f32.xlu0 %v905_v3  ;;  %v906_v5 = vmul.f32 %v904_v4, %v904_v4 }
 0x154   :  { %909 = vadd.xlane.f32.xlu0 %v906_v5 }
 0x198   :  { %v933_v6 = vpop.xlane.xlu1 %932 }
 0x199   :  { %v936_v7 = vmax.f32 %v933_v6, 1e-24 }
 0x19b   :  { %1231 = vrsqrt.f32 %v936_v7 }
 0x19c   :  { %v935_v8 = vpop.xlane.xlu1 %934 }
 0x19d   :  { %v937_v9 = vmax.f32 %v935_v8, 1e-24 }
 0x19f   :  { %1233 = vrsqrt.f32 %v937_v9 }
 0x1a5   :  { %v1232_v10 = vpop.eup %1231 }
 0x1a6   :  { %v940_v11 = vmul.f32 %v1232_v10, %v928_v28 }
 0x1a8   :  { %942 = vst [vmem:[%s1396_s7] sm:$0xff] %v940_v11 }
 0x1a9   :  { %v1234_v12 = vpop.eup %1233 }
 0x1aa   :  { %v941_v13 = vmul.f32 %v1234_v12, %v929_v32 }
 0x1ac   :  { %943 = vst [vmem:[%s1396_s7 + $0x8] sm:$0xff] %v941_v13 }
 0x1dd   :  { %v908_v14 = vpop.xlane.xlu0 %907 }
 0x1de   :  { %v911_v15 = vmax.f32 %v908_v14, 1e-24 }
 0x1e0   :  { %1235 = vrsqrt.f32 %v911_v15 }
 0x1e1   :  { %v910_v16 = vpop.xlane.xlu0 %909 }
 0x1e2   :  { %v912_v17 = vmax.f32 %v910_v16, 1e-24 }
 0x1e4   :  { %1237 = vrsqrt.f32 %v912_v17 }
 0x1ea   :  { %v1236_v18 = vpop.eup %1235 }
 0x1eb   :  { %v915_v19 = vmul.f32 %v1236_v18, %v903_v2 }
 0x1ed   :  { %917 = vst [vmem:[%s1395_s6] sm:$0xff] %v915_v19 }
 0x1ee   :  { %v1238_v20 = vpop.eup %1237 }
 0x1ef   :  { %v916_v21 = vmul.f32 %v1238_v20, %v904_v4 }
 0x1f1   :  { %918 = vst [vmem:[%s1395_s6 + $0x8] sm:$0xff] %v916_v21 }
 0x1f2   :  { %952 = vsyncpa [#allocation5], 1 }

</bundles_post_ra>
